<compile_context>
chip_gen: v7x
topology: tpu7x:2x2x1
jax: 0.10.0
libtpu: 0.0.40
codegen_flags: <defaults>
</compile_context>

<pallas_src>
import functools
import math

import jax
import jax.numpy as jnp
from jax.experimental import pallas as pl
from jax.experimental.pallas import tpu as pltpu


def _leaky_relu(x, slope=0.2):
    return jnp.where(x >= 0, x, slope * x)


def _round_up(x, m):
    return ((x + m - 1) // m) * m


def _cdiv(a, b):
    return -(-a // b)


def _choose_tb(B, block_b=1024):
    """Rows per grid step: big tiles (per-step overhead ~0.35us dominates at
    these feature sizes) but keep >= ~8 steps so v7x megacore + DMA pipelining
    still have work to split/overlap."""
    if B <= 256:
        return _round_up(B, 8)                 # small batch: one (near-)exact tile
    block_b = max(256, _round_up(block_b, 128))
    tb = _round_up(_cdiv(B, 8), 128)           # aim for ~8 grid steps
    return max(256, min(tb, block_b))          # >=256-row tiles for v6e/v7x MXU


# ---------------------------------------------------------------------------
# Kernels
# ---------------------------------------------------------------------------
def _resblock_kernel_proj(x_ref, w13_ref, b13_ref, w2_ref, b2_ref, o_ref, *,
                          hidden, slope, final_nl):
    """Fin != Fout: skip = leaky_relu(fc3(x)); fc1/fc3 fused into one matmul."""
    x = x_ref[...]                                              # (TB, Fin) f32
    # one MXU pass over the shared LHS: z = x @ [w1 | w3]  (bf16 in, f32 acc)
    z = jnp.dot(x.astype(w13_ref.dtype), w13_ref[...],
                preferred_element_type=jnp.float32)
    z = _leaky_relu(z + b13_ref[...], slope)                    # f32 elementwise
    h = z[:, :hidden]                                           # fc1 branch (TB, H_p)
    skip = z[:, hidden:]                                        # fc3 branch (TB, Fout)
    y = jnp.dot(h.astype(w2_ref.dtype), w2_ref[...],
                preferred_element_type=jnp.float32) + b2_ref[...]
    out = skip + y
    if final_nl:
        out = _leaky_relu(out, slope)
    o_ref[...] = out.astype(o_ref.dtype)


def _resblock_kernel_identity(x_ref, w1_ref, b1_ref, w2_ref, b2_ref, o_ref, *,
                              slope, final_nl):
    """Fin == Fout: identity skip (exact f32 residual)."""
    x = x_ref[...]                                              # (TB, Fin) f32
    h = _leaky_relu(jnp.dot(x.astype(w1_ref.dtype), w1_ref[...],
                            preferred_element_type=jnp.float32) + b1_ref[...],
                    slope)
    y = jnp.dot(h.astype(w2_ref.dtype), w2_ref[...],
                preferred_element_type=jnp.float32) + b2_ref[...]
    out = x.astype(jnp.float32) + y
    if final_nl:
        out = _leaky_relu(out, slope)
    o_ref[...] = out.astype(o_ref.dtype)


# ---------------------------------------------------------------------------
# One-time weight preparation (hoisted out of the per-call path)
# ---------------------------------------------------------------------------
def prepare_params(params, compute_dtype=jnp.bfloat16):
    """Cast matmul weights to bf16, pad the hidden dim to a 128 multiple and
    fuse fc1/fc3 into one [w1 | w3] matrix.  Call ONCE (e.g. at model load) so
    the steady-state forward issues no weight HBM traffic outside the kernel."""
    f32 = jnp.float32
    w1 = jnp.asarray(params["w1"])
    w2 = jnp.asarray(params["w2"])
    Fin, H = w1.shape
    Fout = w2.shape[1]
    H_p = _round_up(H, 128)
    dH = H_p - H
    w1p = jnp.pad(w1, ((0, 0), (0, dH))).astype(compute_dtype)
    b1p = jnp.pad(jnp.asarray(params["b1"], f32).reshape(1, H), ((0, 0), (0, dH)))
    w2p = jnp.pad(w2, ((0, dH), (0, 0))).astype(compute_dtype)   # zero K rows
    b2p = jnp.asarray(params["b2"], f32).reshape(1, Fout)
    prep = {"Fin": Fin, "H_p": H_p, "Fout": Fout, "w2": w2p, "b2": b2p}
    if "w3" in params:
        prep["_kind"] = "proj"
        w3p = jnp.asarray(params["w3"]).astype(compute_dtype)
        b3p = jnp.asarray(params["b3"], f32).reshape(1, Fout)
        prep["w13"] = jnp.concatenate([w1p, w3p], axis=1)        # (Fin, H_p+Fout)
        prep["b13"] = jnp.concatenate([b1p, b3p], axis=1)        # (1,   H_p+Fout)
    else:
        prep["_kind"] = "identity"
        prep["w1"] = w1p
        prep["b1"] = b1p
    return prep


# ---------------------------------------------------------------------------
# Forward wrapper
# ---------------------------------------------------------------------------
def resblock_forward(x, params, final_nl=True, *, negative_slope=0.2,
                     block_b=1024, out_dtype=None):
    """Pallas ResBlock.forward.  `params` should come from prepare_params();
    raw params are accepted but will be re-prepared on every call."""
    if "_kind" not in params:
        params = prepare_params(params)   # NOTE: hoist this call out for perf
    assert x.ndim == 2
    B, Fin = x.shape
    assert Fin == params["Fin"], (Fin, params["Fin"])
    H_p, Fout = params["H_p"], params["Fout"]
    has_proj = params["_kind"] == "proj"
    out_dtype = x.dtype if out_dtype is None else out_dtype

    TB = _choose_tb(B, block_b)
    grid = (_cdiv(B, TB),)

    # x / out blocks keep the TRUE feature width (full-array last dim is exempt
    # from the 128 rule) -> no Fin/Fout padding, no wrapper pad/cast/slice ops.
    x_spec = pl.BlockSpec((TB, Fin), lambda i: (i, 0))
    o_spec = pl.BlockSpec((TB, Fout), lambda i: (i, 0))

    if has_proj:
        weights = (params["w13"], params["b13"], params["w2"], params["b2"])
        kernel = functools.partial(_resblock_kernel_proj, hidden=H_p,
                                   slope=negative_slope, final_nl=final_nl)
        flops = 2 * B * (Fin * H_p + H_p * Fout + Fin * Fout)
        z_cols = H_p + Fout
    else:
        weights = (params["w1"], params["b1"], params["w2"], params["b2"])
        kernel = functools.partial(_resblock_kernel_identity,
                                   slope=negative_slope, final_nl=final_nl)
        flops = 2 * B * (Fin * H_p + H_p * Fout)
        z_cols = max(H_p, Fout)

    weight_bytes = sum(int(w.size) * w.dtype.itemsize for w in weights)
    x_bytes = int(x.size) * x.dtype.itemsize
    out_bytes = B * Fout * jnp.dtype(out_dtype).itemsize
    # VMEM need: single-buffered weights + double-buffered x/out tiles + f32 temps.
    tile_bytes = (2 * TB * Fin * x.dtype.itemsize
                  + 2 * TB * Fout * jnp.dtype(out_dtype).itemsize
                  + 2 * TB * z_cols * 4
                  + TB * H_p * 2)
    vmem_limit = int(min(max(1.5 * (weight_bytes + tile_bytes), 8 << 20), 96 << 20))

    def _call(single_buffer_weights):
        if single_buffer_weights:
            # Constant index_map -> weights stay resident; one buffer is enough.
            def resident(a):
                return pl.BlockSpec(a.shape, lambda i: (0, 0),
                                    pipeline_mode=pl.Buffered(1))
        else:
            def resident(a):
                return pl.BlockSpec(a.shape, lambda i: (0, 0))
        return pl.pallas_call(
            kernel,
            out_shape=jax.ShapeDtypeStruct((B, Fout), out_dtype),
            grid=grid,
            in_specs=[x_spec] + [resident(w) for w in weights],
            out_specs=o_spec,
            compiler_params=pltpu.CompilerParams(
                dimension_semantics=("parallel",),   # batch tiles -> v7x megacore
                vmem_limit_bytes=vmem_limit),
            cost_estimate=pl.CostEstimate(
                flops=flops, transcendentals=0,
                bytes_accessed=x_bytes + weight_bytes + out_bytes),
        )(x, *weights)

    try:
        return _call(True)
    except Exception:
        # Fallback if pipeline_mode=pl.Buffered(1) is rejected by this jax build.
        return _call(False)


# ---------------------------------------------------------------------------
# Parameter init (mirrors the module's __init__ shapes; weights as [in, out])
# ---------------------------------------------------------------------------
def make_params(key, Fin, Fout, n_neurons=512, dtype=jnp.float32):
    ks = jax.random.split(key, 6)
    bnd1 = 1.0 / math.sqrt(Fin)
    bnd2 = 1.0 / math.sqrt(n_neurons)
    bnd3 = 1.0 / math.sqrt(Fin)
    params = {
        "w1": jax.random.uniform(ks[0], (Fin, n_neurons), dtype, -bnd1, bnd1),
        "b1": jax.random.uniform(ks[1], (1, n_neurons), dtype, -bnd1, bnd1),
        "w2": jax.random.uniform(ks[2], (n_neurons, Fout), dtype, -bnd2, bnd2),
        "b2": jax.random.uniform(ks[3], (1, Fout), dtype, -bnd2, bnd2),
    }
    if Fin != Fout:
        params["w3"] = jax.random.uniform(ks[4], (Fin, Fout), dtype, -bnd3, bnd3)
        params["b3"] = jax.random.uniform(ks[5], (1, Fout), dtype, -bnd3, bnd3)
    return params


# ---------------------------------------------------------------------------
# Pure-JAX references
# ---------------------------------------------------------------------------
def resblock_ref(x, params, final_nl=True):
    """Full-f32 reference (mirrors the PyTorch forward, slope=0.2)."""
    if "w3" in params:
        skip = _leaky_relu(x @ params["w3"] + params["b3"])
    else:
        skip = x
    h = _leaky_relu(x @ params["w1"] + params["b1"])
    y = h @ params["w2"] + params["b2"]
    out = skip + y
    return _leaky_relu(out) if final_nl else out


def resblock_ref_bf16(x, params, final_nl=True):
    """Reference matching the kernel's precision (bf16 matmul operands,
    f32 accumulation, f32 biases/residual/activations)."""
    bf, f32 = jnp.bfloat16, jnp.float32

    def mm(a, w):
        return jnp.dot(a.astype(bf), w.astype(bf),
                       preferred_element_type=jnp.float32)

    if "w3" in params:
        skip = _leaky_relu(mm(x, params["w3"]) + params["b3"].astype(f32))
    else:
        skip = x.astype(f32)
    h = _leaky_relu(mm(x, params["w1"]) + params["b1"].astype(f32))
    y = mm(h, params["w2"]) + params["b2"].astype(f32)
    out = skip + y
    return _leaky_relu(out) if final_nl else out


if __name__ == "__main__":
    key = jax.random.PRNGKey(0)
    kx1, kp1, kx2, kp2, kx3 = jax.random.split(key, 5)

    # --- projection path (Fin != Fout): B=8, Fin=32, Fout=64, hidden=128 ----
    B, Fin, Fout, H = 8, 32, 64, 128
    x = jax.random.normal(kx1, (B, Fin), dtype=jnp.float32)
    params = make_params(kp1, Fin, Fout, n_neurons=H)
    prep = prepare_params(params)            # one-time weight prep (hoisted)

    out = jax.block_until_ready(resblock_forward(x, prep, final_nl=True))
    assert out.shape == (B, Fout)
    ref_bf = resblock_ref_bf16(x, params, final_nl=True)
    ref_f32 = resblock_ref(x, params, final_nl=True)
    err_bf = float(jnp.max(jnp.abs(out - ref_bf)))
    err_f32 = float(jnp.max(jnp.abs(out - ref_f32)))
    assert jnp.allclose(out, ref_bf, atol=2e-3, rtol=2e-3), f"bf16-ref err {err_bf}"
    assert jnp.allclose(out, ref_f32, atol=5e-2, rtol=5e-2), f"f32-ref err {err_f32}"

    # --- identity path (Fin == Fout), also exercise final_nl=False ----------
    B2, F2, H2 = 8, 64, 128
    x2 = jax.random.normal(kx2, (B2, F2), dtype=jnp.float32)
    params2 = make_params(kp2, F2, F2, n_neurons=H2)
    prep2 = prepare_params(params2)
    out2 = jax.block_until_ready(resblock_forward(x2, prep2, final_nl=False))
    assert out2.shape == (B2, F2)
    ref2 = resblock_ref_bf16(x2, params2, final_nl=False)
    err2 = float(jnp.max(jnp.abs(out2 - ref2)))
    assert jnp.allclose(out2, ref2, atol=2e-3, rtol=2e-3), f"identity err {err2}"

    # --- multi-tile batch (grid > 1, 'parallel' batch axis) -----------------
    B3 = 512
    x3 = jax.random.normal(kx3, (B3, Fin), dtype=jnp.float32)
    out3 = jax.block_until_ready(resblock_forward(x3, prep, final_nl=True))
    assert out3.shape == (B3, Fout)
    ref3 = resblock_ref_bf16(x3, params, final_nl=True)
    err3 = float(jnp.max(jnp.abs(out3 - ref3)))
    assert jnp.allclose(out3, ref3, atol=2e-3, rtol=2e-3), f"batched err {err3}"

    print("KERNEL_OK")
</pallas_src>

<mosaic_0001>
module attributes {stable_mosaic.version = 11 : i64} {
  func.func @_resblock_kernel_proj(%arg0: i32, %arg1: memref<8x32xf32, #tpu.memory_space<vmem>>, %arg2: memref<32x192xbf16, #tpu.memory_space<vmem>>, %arg3: memref<1x192xf32, #tpu.memory_space<vmem>>, %arg4: memref<128x64xbf16, #tpu.memory_space<vmem>>, %arg5: memref<1x64xf32, #tpu.memory_space<vmem>>, %arg6: memref<8x64xf32, #tpu.memory_space<vmem>>) attributes {dimension_semantics = [#tpu.dimension_semantics<parallel>], iteration_bounds = array<i64: 1>, scalar_prefetch = 0 : i64, scratch_operands = 0 : i64, tpu.core_type = #tpu.core_type<tc>, window_params = [{transform_indices = @transform_0, window_bounds = array<i64: 8, 32>}, {pipeline_mode = #tpu.pipeline_mode<synchronous>, transform_indices = @transform_1, window_bounds = array<i64: 32, 192>}, {pipeline_mode = #tpu.pipeline_mode<synchronous>, transform_indices = @transform_2, window_bounds = array<i64: 1, 192>}, {pipeline_mode = #tpu.pipeline_mode<synchronous>, transform_indices = @transform_3, window_bounds = array<i64: 128, 64>}, {pipeline_mode = #tpu.pipeline_mode<synchronous>, transform_indices = @transform_4, window_bounds = array<i64: 1, 64>}, {transform_indices = @transform_5, window_bounds = array<i64: 8, 64>}]} {
    %c0 = arith.constant 0 : index
    %c0_0 = arith.constant 0 : index
    %0 = vector.load %arg1[%c0, %c0_0] : memref<8x32xf32, #tpu.memory_space<vmem>>, vector<8x32xf32>
    %1 = arith.truncf %0 : vector<8x32xf32> to vector<8x32xbf16>
    %c0_1 = arith.constant 0 : index
    %c0_2 = arith.constant 0 : index
    %2 = vector.load %arg2[%c0_1, %c0_2] : memref<32x192xbf16, #tpu.memory_space<vmem>>, vector<32x192xbf16>
    %cst = arith.constant dense<0.000000e+00> : vector<8x192xf32>
    %3 = tpu.matmul %1, %2, %cst {dimension_numbers = #tpu.dot_dimension_numbers<[1], [0], [0], [1], [0, 0, 1, 1], [], []>} : vector<8x32xbf16>, vector<32x192xbf16>, vector<8x192xf32> -> vector<8x192xf32>
    %c0_3 = arith.constant 0 : index
    %c0_4 = arith.constant 0 : index
    %4 = vector.load %arg3[%c0_3, %c0_4] : memref<1x192xf32, #tpu.memory_space<vmem>>, vector<1x192xf32>
    %5 = vector.broadcast %4 : vector<1x192xf32> to vector<8x192xf32>
    %6 = arith.addf %3, %5 : vector<8x192xf32>
    %cst_5 = arith.constant 0.000000e+00 : f32
    %7 = vector.broadcast %cst_5 : f32 to vector<8x192xf32>
    %8 = arith.cmpf oge, %6, %7 : vector<8x192xf32>
    %cst_6 = arith.constant 2.000000e-01 : f32
    %9 = vector.broadcast %cst_6 : f32 to vector<8x192xf32>
    %10 = arith.mulf %9, %6 : vector<8x192xf32>
    %11 = arith.select %8, %6, %10 : vector<8x192xi1>, vector<8x192xf32>
    %12 = vector.extract_strided_slice %11 {offsets = [0, 0], sizes = [8, 128], strides = [1, 1]} : vector<8x192xf32> to vector<8x128xf32>
    %13 = vector.extract_strided_slice %11 {offsets = [0, 128], sizes = [8, 64], strides = [1, 1]} : vector<8x192xf32> to vector<8x64xf32>
    %14 = arith.truncf %12 : vector<8x128xf32> to vector<8x128xbf16>
    %c0_7 = arith.constant 0 : index
    %c0_8 = arith.constant 0 : index
    %15 = vector.load %arg4[%c0_7, %c0_8] : memref<128x64xbf16, #tpu.memory_space<vmem>>, vector<128x64xbf16>
    %cst_9 = arith.constant dense<0.000000e+00> : vector<8x64xf32>
    %16 = tpu.matmul %14, %15, %cst_9 {dimension_numbers = #tpu.dot_dimension_numbers<[1], [0], [0], [1], [0, 0, 1, 1], [], []>} : vector<8x128xbf16>, vector<128x64xbf16>, vector<8x64xf32> -> vector<8x64xf32>
    %c0_10 = arith.constant 0 : index
    %c0_11 = arith.constant 0 : index
    %17 = vector.load %arg5[%c0_10, %c0_11] : memref<1x64xf32, #tpu.memory_space<vmem>>, vector<1x64xf32>
    %18 = vector.broadcast %17 : vector<1x64xf32> to vector<8x64xf32>
    %19 = arith.addf %16, %18 : vector<8x64xf32>
    %20 = arith.addf %13, %19 : vector<8x64xf32>
    %cst_12 = arith.constant 0.000000e+00 : f32
    %21 = vector.broadcast %cst_12 : f32 to vector<8x64xf32>
    %22 = arith.cmpf oge, %20, %21 : vector<8x64xf32>
    %cst_13 = arith.constant 2.000000e-01 : f32
    %23 = vector.broadcast %cst_13 : f32 to vector<8x64xf32>
    %24 = arith.mulf %23, %20 : vector<8x64xf32>
    %25 = arith.select %22, %20, %24 : vector<8x64xi1>, vector<8x64xf32>
    %c0_14 = arith.constant 0 : index
    %c0_15 = arith.constant 0 : index
    %26 = vector.load %arg6[%c0_14, %c0_15] : memref<8x64xf32, #tpu.memory_space<vmem>>, vector<8x64xf32>
    tpu.vector_store %arg6[%c0_14, %c0_15], %25 {strides = array<i32>} : memref<8x64xf32, #tpu.memory_space<vmem>>, vector<8x64xf32>,
    return
  }
  func.func @transform_0(%arg0: i32) -> (i32, i32) {
    %c0_i32 = arith.constant 0 : i32
    %c0_i32_0 = arith.constant 0 : i32
    return %arg0, %c0_i32 : i32, i32
  }
  func.func @transform_1(%arg0: i32) -> (i32, i32) {
    %c0_i32 = arith.constant 0 : i32
    %c0_i32_0 = arith.constant 0 : i32
    %c0_i32_1 = arith.constant 0 : i32
    return %c0_i32, %c0_i32_0 : i32, i32
  }
  func.func @transform_2(%arg0: i32) -> (i32, i32) {
    %c0_i32 = arith.constant 0 : i32
    %c0_i32_0 = arith.constant 0 : i32
    %c0_i32_1 = arith.constant 0 : i32
    return %c0_i32, %c0_i32_0 : i32, i32
  }
  func.func @transform_3(%arg0: i32) -> (i32, i32) {
    %c0_i32 = arith.constant 0 : i32
    %c0_i32_0 = arith.constant 0 : i32
    %c0_i32_1 = arith.constant 0 : i32
    return %c0_i32, %c0_i32_0 : i32, i32
  }
  func.func @transform_4(%arg0: i32) -> (i32, i32) {
    %c0_i32 = arith.constant 0 : i32
    %c0_i32_0 = arith.constant 0 : i32
    %c0_i32_1 = arith.constant 0 : i32
    return %c0_i32, %c0_i32_0 : i32, i32
  }
  func.func @transform_5(%arg0: i32) -> (i32, i32) {
    %c0_i32 = arith.constant 0 : i32
    %c0_i32_0 = arith.constant 0 : i32
    return %arg0, %c0_i32 : i32, i32
  }
}

module attributes {stable_mosaic.version = 11 : i64} {
  func.func @_resblock_kernel_proj(%arg0: i32, %arg1: memref<8x32xf32, #tpu.memory_space<vmem>>, %arg2: memref<32x192xbf16, #tpu.memory_space<vmem>>, %arg3: memref<1x192xf32, #tpu.memory_space<vmem>>, %arg4: memref<128x64xbf16, #tpu.memory_space<vmem>>, %arg5: memref<1x64xf32, #tpu.memory_space<vmem>>, %arg6: memref<8x64xf32, #tpu.memory_space<vmem>>) attributes {dimension_semantics = [#tpu.dimension_semantics<parallel>], iteration_bounds = array<i64: 1>, scalar_prefetch = 0 : i64, scratch_operands = 0 : i64, tpu.core_type = #tpu.core_type<tc>, window_params = [{transform_indices = @transform_0, window_bounds = array<i64: 8, 32>}, {pipeline_mode = #tpu.pipeline_mode<synchronous>, transform_indices = @transform_1, window_bounds = array<i64: 32, 192>}, {pipeline_mode = #tpu.pipeline_mode<synchronous>, transform_indices = @transform_2, window_bounds = array<i64: 1, 192>}, {pipeline_mode = #tpu.pipeline_mode<synchronous>, transform_indices = @transform_3, window_bounds = array<i64: 128, 64>}, {pipeline_mode = #tpu.pipeline_mode<synchronous>, transform_indices = @transform_4, window_bounds = array<i64: 1, 64>}, {transform_indices = @transform_5, window_bounds = array<i64: 8, 64>}]} {
    %c0 = arith.constant 0 : index
    %c0_0 = arith.constant 0 : index
    %0 = vector.load %arg1[%c0, %c0_0] : memref<8x32xf32, #tpu.memory_space<vmem>>, vector<8x32xf32>
    %1 = arith.truncf %0 : vector<8x32xf32> to vector<8x32xbf16>
    %c0_1 = arith.constant 0 : index
    %c0_2 = arith.constant 0 : index
    %2 = vector.load %arg2[%c0_1, %c0_2] : memref<32x192xbf16, #tpu.memory_space<vmem>>, vector<32x192xbf16>
    %cst = arith.constant dense<0.000000e+00> : vector<8x192xf32>
    %3 = tpu.matmul %1, %2, %cst {dimension_numbers = #tpu.dot_dimension_numbers<[1], [0], [0], [1], [0, 0, 1, 1], [], []>} : vector<8x32xbf16>, vector<32x192xbf16>, vector<8x192xf32> -> vector<8x192xf32>
    %c0_3 = arith.constant 0 : index
    %c0_4 = arith.constant 0 : index
    %4 = vector.load %arg3[%c0_3, %c0_4] : memref<1x192xf32, #tpu.memory_space<vmem>>, vector<1x192xf32>
    %5 = vector.broadcast %4 : vector<1x192xf32> to vector<8x192xf32>
    %6 = arith.addf %3, %5 : vector<8x192xf32>
    %cst_5 = arith.constant 0.000000e+00 : f32
    %7 = vector.broadcast %cst_5 : f32 to vector<8x192xf32>
    %8 = arith.cmpf oge, %6, %7 : vector<8x192xf32>
    %cst_6 = arith.constant 2.000000e-01 : f32
    %9 = vector.broadcast %cst_6 : f32 to vector<8x192xf32>
    %10 = arith.mulf %9, %6 : vector<8x192xf32>
    %11 = arith.select %8, %6, %10 : vector<8x192xi1>, vector<8x192xf32>
    %12 = vector.extract_strided_slice %11 {offsets = [0, 0], sizes = [8, 128], strides = [1, 1]} : vector<8x192xf32> to vector<8x128xf32>
    %13 = vector.extract_strided_slice %11 {offsets = [0, 128], sizes = [8, 64], strides = [1, 1]} : vector<8x192xf32> to vector<8x64xf32>
    %14 = arith.truncf %12 : vector<8x128xf32> to vector<8x128xbf16>
    %c0_7 = arith.constant 0 : index
    %c0_8 = arith.constant 0 : index
    %15 = vector.load %arg4[%c0_7, %c0_8] : memref<128x64xbf16, #tpu.memory_space<vmem>>, vector<128x64xbf16>
    %cst_9 = arith.constant dense<0.000000e+00> : vector<8x64xf32>
    %16 = tpu.matmul %14, %15, %cst_9 {dimension_numbers = #tpu.dot_dimension_numbers<[1], [0], [0], [1], [0, 0, 1, 1], [], []>} : vector<8x128xbf16>, vector<128x64xbf16>, vector<8x64xf32> -> vector<8x64xf32>
    %c0_10 = arith.constant 0 : index
    %c0_11 = arith.constant 0 : index
    %17 = vector.load %arg5[%c0_10, %c0_11] : memref<1x64xf32, #tpu.memory_space<vmem>>, vector<1x64xf32>
    %18 = vector.broadcast %17 : vector<1x64xf32> to vector<8x64xf32>
    %19 = arith.addf %16, %18 : vector<8x64xf32>
    %20 = arith.addf %13, %19 : vector<8x64xf32>
    %cst_12 = arith.constant 0.000000e+00 : f32
    %21 = vector.broadcast %cst_12 : f32 to vector<8x64xf32>
    %22 = arith.cmpf oge, %20, %21 : vector<8x64xf32>
    %cst_13 = arith.constant 2.000000e-01 : f32
    %23 = vector.broadcast %cst_13 : f32 to vector<8x64xf32>
    %24 = arith.mulf %23, %20 : vector<8x64xf32>
    %25 = arith.select %22, %20, %24 : vector<8x64xi1>, vector<8x64xf32>
    %c0_14 = arith.constant 0 : index
    %c0_15 = arith.constant 0 : index
    %26 = vector.load %arg6[%c0_14, %c0_15] : memref<8x64xf32, #tpu.memory_space<vmem>>, vector<8x64xf32>
    tpu.vector_store %arg6[%c0_14, %c0_15], %25 {strides = array<i32>} : memref<8x64xf32, #tpu.memory_space<vmem>>, vector<8x64xf32>,
    return
  }
  func.func @transform_0(%arg0: i32) -> (i32, i32) {
    %c0_i32 = arith.constant 0 : i32
    %c0_i32_0 = arith.constant 0 : i32
    return %arg0, %c0_i32 : i32, i32
  }
  func.func @transform_1(%arg0: i32) -> (i32, i32) {
    %c0_i32 = arith.constant 0 : i32
    %c0_i32_0 = arith.constant 0 : i32
    %c0_i32_1 = arith.constant 0 : i32
    return %c0_i32, %c0_i32_0 : i32, i32
  }
  func.func @transform_2(%arg0: i32) -> (i32, i32) {
    %c0_i32 = arith.constant 0 : i32
    %c0_i32_0 = arith.constant 0 : i32
    %c0_i32_1 = arith.constant 0 : i32
    return %c0_i32, %c0_i32_0 : i32, i32
  }
  func.func @transform_3(%arg0: i32) -> (i32, i32) {
    %c0_i32 = arith.constant 0 : i32
    %c0_i32_0 = arith.constant 0 : i32
    %c0_i32_1 = arith.constant 0 : i32
    return %c0_i32, %c0_i32_0 : i32, i32
  }
  func.func @transform_4(%arg0: i32) -> (i32, i32) {
    %c0_i32 = arith.constant 0 : i32
    %c0_i32_0 = arith.constant 0 : i32
    %c0_i32_1 = arith.constant 0 : i32
    return %c0_i32, %c0_i32_0 : i32, i32
  }
  func.func @transform_5(%arg0: i32) -> (i32, i32) {
    %c0_i32 = arith.constant 0 : i32
    %c0_i32_0 = arith.constant 0 : i32
    return %arg0, %c0_i32 : i32, i32
  }
}

</mosaic_0001>

<bundles_post_ra>
// kernel: tpu_custom_call.1
= control target key start
LH: loop header
LB: loop body
LE: loop exit
PB: predicated region body
PF: predicated region fallthrough
CT: control target
= control target key end

     0   :  { %v328_v2 = vmov 0   ;;  %v329_v6 = vmov 0.0   ;;  %vm60_vm0 = vcmask 261120   ;;  %s419_s0 = inlined_call_operand.vmem [shape: f32[8,32], index: 0, kind: input, shape index: {}]   ;;  %s420_s1 = inlined_call_operand.vmem [shape: bf16[32,192], index: 1, kind: input, shape index: {}]   ;;  %s421_s2 = inlined_call_operand.vmem [shape: f32[1,192], index: 2, kind: input, shape index: {}]   ;;  %s422_s3 = inlined_call_operand.vmem [shape: bf16[128,64], index: 3, kind: input, shape index: {}]   ;;  %s423_s4 = inlined_call_operand.vmem [shape: f32[1,64], index: 4, kind: input, shape index: {}]   ;;  %s424_s5 = inlined_call_operand.hbm [shape: f32[8,64], index: 5, kind: output, shape index: {}]  }
   0x1   :  { %v290_v0 = vld [vmem:[%s420_s1 + $0x4] ss:$8 sps:$4 sm:$0xff]   ;;  %v292_v1 = vld [vmem:[%s420_s1] ss:$8 sps:$4 sm:$0xff]   ;;  %96 = vmatprep.mubr.bf16.mxu0 %v328_v2  ;;  %v293_v3 = vld [vmem:[%s420_s1 + $0x14] ss:$8 sps:$4 sm:$0xff]   ;;  %266 = vmatprep.subr.bf16.mxu1 %v329_v6 }
   0x2   :  { %64 = vmatprep.subr.bf16.mxu0 %v290_v0  ;;  %v295_v4 = vld [vmem:[%s420_s1 + $0x10] ss:$8 sps:$4 sm:$0xff]   ;;  %v22_v5 = vld [vmem:[%s419_s0] sm:$0xff]  ;;  %v297_v8 = vld [vmem:[%s422_s3 + $0x8] sm:$0xff]  }
   0x3   :  { %65 = vmatpush1.bf16.msra.mxu0 %v292_v1  ;;  %v296_v7 = vld [vmem:[%s422_s3] sm:$0xff]   ;;  %v23_v9 = vpack.c.bf16 %v22_v5, %v22_v5  ;;  %v298_v10 = vld [vmem:[%s422_s3 + $0x10] sm:$0xff]  }
   0x4   :  { %66 = vmatprep.subr.bf16.mxu0 %v293_v3  ;;  %267 = vmatpush3.bf16.msra.mxu1 %v296_v7 }
   0x5   :  { %268 = vmatprep.subr.bf16.mxu1 %v329_v6 }
   0x7   :  { %67 = vmatpush1.bf16.msra.mxu0 %v295_v4 }
   0x8   :  { %269 = vmatpush3.bf16.msra.mxu1 %v297_v8 }
   0x9   :  { %270 = vmatprep.subr.bf16.mxu1 %v329_v6 }
   0xa   :  { %247 = vmatmul.mubr.msk.bf16.vlgmr.msra.gmra.mrb[0].mxu0 %vm60_vm0, %v23_v9 }
   0xb   :  { %10 = vsyncpa [#allocation3], 0  ;;  %v299_v11 = vld [vmem:[%s422_s3 + $0x18] sm:$0xff]   ;;  %v300_v12 = vld [vmem:[%s422_s3 + $0x20] sm:$0xff]   ;;  %vm330_vm1 = vmmov 0   ;;  %v30_v16 = vlaneseq  ;;  %vm227_vm5 = vcmask 523264  }
   0xc   :  { %271 = vmatpush3.bf16.msra.mxu1 %v298_v10  ;;  %v301_v13 = vld [vmem:[%s422_s3 + $0x28] sm:$0xff]   ;;  %v302_v14 = vld [vmem:[%s422_s3 + $0x30] sm:$0xff]   ;;  %v303_v15 = vld [vmem:[%s422_s3 + $0x38] sm:$0xff]   ;;  %282 = vmatprep.mubr.msk.bf16.mxu1 %vm330_vm1, %v329_v6 }
   0xd   :  { %272 = vmatprep.subr.bf16.mxu1 %v329_v6  ;;  %v31_v17 = vshrl.u32 %v30_v16, 7  ;;  %v28_v19 = vld [vmem:[%s421_s2] sm:$0x3]  ;;  %s331_s2 = smov [#allocation2]  }
   0xe   :  { %v248_v33 = vld [vmem:[%s423_s4] ss:$0 sm:$0xff]  ;;  %s235_s20 = sshll.u32 %s331_s2, 4  ;;  %s236_s20 = int_to_ptr.vmem [resolvable:$true] %s235_s20 }
   0xf   :  { %v32_v18 = vsub.s32 0, %v31_v17  ;;  %v36_v29 = vsub.s32 1, %v31_v17  ;;  %s304_s21 = scalar_lea.vmem %s236_s20, 128  ;;  %p309_p1 = scmp.lt.s32.totalorder %s236_s20, %s236_s20 }
  0x10   :  { %273 = vmatpush3.bf16.msra.mxu1 %v299_v11  ;;  %p305_p0 = scmp.ne.s32.totalorder %s236_s20, %s304_s21  ;;  %p310_p2 = scmp.lt.s32.totalorder %s304_s21, %s304_s21 }
  0x11   :  { %274 = vmatprep.subr.bf16.mxu1 %v329_v6  ;;  %v33_v20 = vrot.slane %v28_v19, %v32_v18  ;;  %v37_v30 = vrot.slane %v28_v19, %v36_v29 }
  0x12   :  { %p311_p3 = por %p310_p2, %p309_p1 }
  0x14   :  { %275 = vmatpush3.bf16.msra.mxu1 %v300_v12  ;;  %p312_p4 = pnand %p311_p3, %p305_p0 }
  0x15   :  { %276 = vmatprep.subr.bf16.mxu1 %v329_v6 }
  0x18   :  { %277 = vmatpush3.bf16.msra.mxu1 %v301_v13 }
  0x19   :  { %278 = vmatprep.subr.bf16.mxu1 %v329_v6 }
  0x1c   :  { %279 = vmatpush3.bf16.msra.mxu1 %v302_v14 }
  0x1d   :  { %280 = vmatprep.subr.bf16.mxu1 %v329_v6 }
  0x20   :  { %281 = vmatpush3.bf16.msra.mxu1 %v303_v15 }
  0xdd   :  { %v98_v21 = vpop.f32.mrb[0].mxu0 }
  0xde   :  { %v99_v22 = vadd.f32 %v98_v21, %v33_v20  ;;  %v100_v23 = vpop.f32.mrb[1].mxu0 }
  0xdf   :  { %v102_v24 = vpop.f32.mrb[2].mxu0  ;;  %v101_v31 = vadd.f32 %v100_v23, %v37_v30 }
  0xe0   :  { %vm105_vm2 = vcmp.ge.f32.partialorder %v99_v22, 0.0  ;;  %v107_v25 = vmul.f32 0.2, %v99_v22  ;;  %v103_v26 = vpop.f32.mrb[3].mxu0 }
  0xe1   :  { %v108_v32 = vmul.f32 0.2, %v101_v31  ;;  %vm106_vm3 = vcmp.ge.f32.partialorder %v101_v31, 0.0 }
  0xe2   :  { %v109_v27 = vsel %vm105_vm2, %v99_v22, %v107_v25 }
  0xe3   :  { %v111_v28 = vpack.c.bf16 %v109_v27, %v109_v27  ;;  %v110_v37 = vsel %vm106_vm3, %v101_v31, %v108_v32 }
  0xe5   :  { %283 = vmatmul.mubr.bf16.vlgmr.msra.gmra.mrb[0].mxu1 %v111_v28 }
 0x1b8   :  { %v217_v34 = vpop.f32.mrb[0].mxu1 }
 0x1b9   :  { %v218_v35 = vadd.f32 %v248_v33, %v217_v34  ;;  %v284_v36 = vpop.f32.mrb[1].mxu1 }
 0x1ba   :  { %v220_v38 = vpop.f32.mrb[2].mxu1 }
 0x1bb   :  { %v223_v39 = vadd.f32 %v218_v35, %v110_v37  ;;  %v285_v40 = vpop.f32.mrb[3].mxu1 }
 0x1bd   :  { %v225_v41 = vmul.f32 0.2, %v223_v39  ;;  %vm224_vm4 = vcmp.ge.f32.partialorder %v223_v39, 0.0 }
 0x1bf   :  { %v226_v42 = vsel %vm224_vm4, %v223_v39, %v225_v41 }
 0x1c0   :  { %228 = vst.msk [vmem:[#allocation2] sm:$0xff] %vm227_vm5, %v226_v42 }
 0x1c1   :  { %315 = shalt.err (!%p312_p4)
}
 0x1c2   :  { %s316_s23 = scalar_lea.hbm %s424_s5, 128 }
 0x1c3   :  { %p317_p5 = scmp.ne.s32.totalorder %s424_s5, %s316_s23  ;;  %p320_p6 = scmp.lt.u32.totalorder %s316_s23, %s424_s5 }
 0x1c5   :  { %p322_p7 = pnand %p320_p6, %p317_p5 }
 0x1c7   :  { %325 = shalt.err (!%p322_p7)
}
 0x1c8   :  { %238 = dma.vmem_to_hbm [thread:$0]  %s236_s20, 128, %s424_s5, [#allocation3]  }
 0x1c9   :  { %326 = dma.done.wait [#allocation3], 128  }
 0x1ca   :  { %327 = vsyncadd [#allocation3], 4294967168 }
 0x1cb   :  { %242 = vsyncpa [#allocation3], 1 }

// kernel: tpu_custom_call.1
= control target key start
LH: loop header
LB: loop body
LE: loop exit
PB: predicated region body
PF: predicated region fallthrough
CT: control target
= control target key end

     0   :  { %v328_v2 = vmov 0   ;;  %v329_v6 = vmov 0.0   ;;  %vm60_vm0 = vcmask 261120   ;;  %s419_s0 = inlined_call_operand.vmem [shape: f32[8,32], index: 0, kind: input, shape index: {}]   ;;  %s420_s1 = inlined_call_operand.vmem [shape: bf16[32,192], index: 1, kind: input, shape index: {}]   ;;  %s421_s2 = inlined_call_operand.vmem [shape: f32[1,192], index: 2, kind: input, shape index: {}]   ;;  %s422_s3 = inlined_call_operand.vmem [shape: bf16[128,64], index: 3, kind: input, shape index: {}]   ;;  %s423_s4 = inlined_call_operand.vmem [shape: f32[1,64], index: 4, kind: input, shape index: {}]   ;;  %s424_s5 = inlined_call_operand.hbm [shape: f32[8,64], index: 5, kind: output, shape index: {}]  }
   0x1   :  { %v290_v0 = vld [vmem:[%s420_s1 + $0x4] ss:$8 sps:$4 sm:$0xff]   ;;  %v292_v1 = vld [vmem:[%s420_s1] ss:$8 sps:$4 sm:$0xff]   ;;  %96 = vmatprep.mubr.bf16.mxu0 %v328_v2  ;;  %v293_v3 = vld [vmem:[%s420_s1 + $0x14] ss:$8 sps:$4 sm:$0xff]   ;;  %266 = vmatprep.subr.bf16.mxu1 %v329_v6 }
   0x2   :  { %64 = vmatprep.subr.bf16.mxu0 %v290_v0  ;;  %v295_v4 = vld [vmem:[%s420_s1 + $0x10] ss:$8 sps:$4 sm:$0xff]   ;;  %v22_v5 = vld [vmem:[%s419_s0] sm:$0xff]  ;;  %v297_v8 = vld [vmem:[%s422_s3 + $0x8] sm:$0xff]  }
   0x3   :  { %65 = vmatpush1.bf16.msra.mxu0 %v292_v1  ;;  %v296_v7 = vld [vmem:[%s422_s3] sm:$0xff]   ;;  %v23_v9 = vpack.c.bf16 %v22_v5, %v22_v5  ;;  %v298_v10 = vld [vmem:[%s422_s3 + $0x10] sm:$0xff]  }
   0x4   :  { %66 = vmatprep.subr.bf16.mxu0 %v293_v3  ;;  %267 = vmatpush3.bf16.msra.mxu1 %v296_v7 }
   0x5   :  { %268 = vmatprep.subr.bf16.mxu1 %v329_v6 }
   0x7   :  { %67 = vmatpush1.bf16.msra.mxu0 %v295_v4 }
   0x8   :  { %269 = vmatpush3.bf16.msra.mxu1 %v297_v8 }
   0x9   :  { %270 = vmatprep.subr.bf16.mxu1 %v329_v6 }
   0xa   :  { %247 = vmatmul.mubr.msk.bf16.vlgmr.msra.gmra.mrb[0].mxu0 %vm60_vm0, %v23_v9 }
   0xb   :  { %10 = vsyncpa [#allocation3], 0  ;;  %v299_v11 = vld [vmem:[%s422_s3 + $0x18] sm:$0xff]   ;;  %v300_v12 = vld [vmem:[%s422_s3 + $0x20] sm:$0xff]   ;;  %vm330_vm1 = vmmov 0   ;;  %v30_v16 = vlaneseq  ;;  %vm227_vm5 = vcmask 523264  }
   0xc   :  { %271 = vmatpush3.bf16.msra.mxu1 %v298_v10  ;;  %v301_v13 = vld [vmem:[%s422_s3 + $0x28] sm:$0xff]   ;;  %v302_v14 = vld [vmem:[%s422_s3 + $0x30] sm:$0xff]   ;;  %v303_v15 = vld [vmem:[%s422_s3 + $0x38] sm:$0xff]   ;;  %282 = vmatprep.mubr.msk.bf16.mxu1 %vm330_vm1, %v329_v6 }
   0xd   :  { %272 = vmatprep.subr.bf16.mxu1 %v329_v6  ;;  %v31_v17 = vshrl.u32 %v30_v16, 7  ;;  %v28_v19 = vld [vmem:[%s421_s2] sm:$0x3]  ;;  %s331_s2 = smov [#allocation2]  }
   0xe   :  { %v248_v33 = vld [vmem:[%s423_s4] ss:$0 sm:$0xff]  ;;  %s235_s20 = sshll.u32 %s331_s2, 4  ;;  %s236_s20 = int_to_ptr.vmem [resolvable:$true] %s235_s20 }
   0xf   :  { %v32_v18 = vsub.s32 0, %v31_v17  ;;  %v36_v29 = vsub.s32 1, %v31_v17  ;;  %s304_s21 = scalar_lea.vmem %s236_s20, 128  ;;  %p309_p1 = scmp.lt.s32.totalorder %s236_s20, %s236_s20 }
  0x10   :  { %273 = vmatpush3.bf16.msra.mxu1 %v299_v11  ;;  %p305_p0 = scmp.ne.s32.totalorder %s236_s20, %s304_s21  ;;  %p310_p2 = scmp.lt.s32.totalorder %s304_s21, %s304_s21 }
  0x11   :  { %274 = vmatprep.subr.bf16.mxu1 %v329_v6  ;;  %v33_v20 = vrot.slane %v28_v19, %v32_v18  ;;  %v37_v30 = vrot.slane %v28_v19, %v36_v29 }
  0x12   :  { %p311_p3 = por %p310_p2, %p309_p1 }
  0x14   :  { %275 = vmatpush3.bf16.msra.mxu1 %v300_v12  ;;  %p312_p4 = pnand %p311_p3, %p305_p0 }
  0x15   :  { %276 = vmatprep.subr.bf16.mxu1 %v329_v6 }
  0x18   :  { %277 = vmatpush3.bf16.msra.mxu1 %v301_v13 }
  0x19   :  { %278 = vmatprep.subr.bf16.mxu1 %v329_v6 }
  0x1c   :  { %279 = vmatpush3.bf16.msra.mxu1 %v302_v14 }
  0x1d   :  { %280 = vmatprep.subr.bf16.mxu1 %v329_v6 }
  0x20   :  { %281 = vmatpush3.bf16.msra.mxu1 %v303_v15 }
  0xdd   :  { %v98_v21 = vpop.f32.mrb[0].mxu0 }
  0xde   :  { %v99_v22 = vadd.f32 %v98_v21, %v33_v20  ;;  %v100_v23 = vpop.f32.mrb[1].mxu0 }
  0xdf   :  { %v102_v24 = vpop.f32.mrb[2].mxu0  ;;  %v101_v31 = vadd.f32 %v100_v23, %v37_v30 }
  0xe0   :  { %vm105_vm2 = vcmp.ge.f32.partialorder %v99_v22, 0.0  ;;  %v107_v25 = vmul.f32 0.2, %v99_v22  ;;  %v103_v26 = vpop.f32.mrb[3].mxu0 }
  0xe1   :  { %v108_v32 = vmul.f32 0.2, %v101_v31  ;;  %vm106_vm3 = vcmp.ge.f32.partialorder %v101_v31, 0.0 }
  0xe2   :  { %v109_v27 = vsel %vm105_vm2, %v99_v22, %v107_v25 }
  0xe3   :  { %v111_v28 = vpack.c.bf16 %v109_v27, %v109_v27  ;;  %v110_v37 = vsel %vm106_vm3, %v101_v31, %v108_v32 }
  0xe5   :  { %283 = vmatmul.mubr.bf16.vlgmr.msra.gmra.mrb[0].mxu1 %v111_v28 }
 0x1b8   :  { %v217_v34 = vpop.f32.mrb[0].mxu1 }
 0x1b9   :  { %v218_v35 = vadd.f32 %v248_v33, %v217_v34  ;;  %v284_v36 = vpop.f32.mrb[1].mxu1 }
 0x1ba   :  { %v220_v38 = vpop.f32.mrb[2].mxu1 }
 0x1bb   :  { %v223_v39 = vadd.f32 %v218_v35, %v110_v37  ;;  %v285_v40 = vpop.f32.mrb[3].mxu1 }
 0x1bd   :  { %v225_v41 = vmul.f32 0.2, %v223_v39  ;;  %vm224_vm4 = vcmp.ge.f32.partialorder %v223_v39, 0.0 }
 0x1bf   :  { %v226_v42 = vsel %vm224_vm4, %v223_v39, %v225_v41 }
 0x1c0   :  { %228 = vst.msk [vmem:[#allocation2] sm:$0xff] %vm227_vm5, %v226_v42 }
 0x1c1   :  { %315 = shalt.err (!%p312_p4)
}
 0x1c2   :  { %s316_s23 = scalar_lea.hbm %s424_s5, 128 }
 0x1c3   :  { %p317_p5 = scmp.ne.s32.totalorder %s424_s5, %s316_s23  ;;  %p320_p6 = scmp.lt.u32.totalorder %s316_s23, %s424_s5 }
 0x1c5   :  { %p322_p7 = pnand %p320_p6, %p317_p5 }
 0x1c7   :  { %325 = shalt.err (!%p322_p7)
}
 0x1c8   :  { %238 = dma.vmem_to_hbm [thread:$0]  %s236_s20, 128, %s424_s5, [#allocation3]  }
 0x1c9   :  { %326 = dma.done.wait [#allocation3], 128  }
 0x1ca   :  { %327 = vsyncadd [#allocation3], 4294967168 }
 0x1cb   :  { %242 = vsyncpa [#allocation3], 1 }

</bundles_post_ra>
